<compile_context>
chip_gen: v6e
topology: v6e:2x2x1
jax: 0.10.0
libtpu: 0.0.40
codegen_flags: <defaults>
</compile_context>

<pallas_src>
import functools

import jax
import jax.numpy as jnp
from jax.experimental import pallas as pl
from jax.experimental.pallas import tpu as pltpu

EMB = 128      # embedding_dim (default of the module)
HID = 512      # ff hidden dim
SEQ = 8        # seq_len for the example
BATCH = 2
EPS = 1e-5     # nn.LayerNorm default eps


def _layer_norm(x, w, b):
    mu = jnp.mean(x, axis=-1, keepdims=True)
    var = jnp.mean((x - mu) ** 2, axis=-1, keepdims=True)
    return (x - mu) * jax.lax.rsqrt(var + EPS) * w + b


def attention_layer_kernel(
    x_ref, dist_ref,
    vec_ref, bqkv_ref, b1_ref,
    wqkv_ref, wo_ref, w1_ref, w2_ref,
    out_ref,
):
    BC, S, D = x_ref.shape
    N = BC * S

    x = x_ref[...].astype(jnp.float32)          # (BC, S, D)
    dist = dist_ref[...].astype(jnp.float32)    # (BC, S, S)

    # Packed small parameter vectors (rows of a (6, D) block).
    vecs = vec_ref[...]
    ln1_w, ln1_b = vecs[0:1, :], vecs[1:2, :]
    ln2_w, ln2_b = vecs[2:3, :], vecs[3:4, :]
    bo, b2 = vecs[4:5, :], vecs[5:6, :]
    bqkv = bqkv_ref[...]                        # (1, 3D)  (q bias pre-scaled)
    b1 = b1_ref[...]                            # (1, HID)

    # Work on the flattened (BC*S, D) view for all dense projections.
    xf = x.reshape(N, D)

    # ---- LayerNorm1 (f32) -------------------------------------------------
    h = _layer_norm(xf, ln1_w, ln1_b)

    # ---- Attention (AAFM stand-in): fused QKV, bf16 MXU, f32 accumulation --
    qkv = jnp.dot(h.astype(jnp.bfloat16), wqkv_ref[...],
                  preferred_element_type=jnp.float32) + bqkv   # (N, 3D)
    q = qkv[:, 0 * D:1 * D].reshape(BC, S, D)   # already scaled by 1/sqrt(D)
    k = qkv[:, 1 * D:2 * D].reshape(BC, S, D)
    v = qkv[:, 2 * D:3 * D].reshape(BC, S, D)

    scores = jnp.einsum(
        "bqd,bkd->bqk",
        q.astype(jnp.bfloat16), k.astype(jnp.bfloat16),
        preferred_element_type=jnp.float32) - dist             # (BC, S, S)

    scores = scores - jnp.max(scores, axis=-1, keepdims=True)
    p = jnp.exp(scores)
    p = p / jnp.sum(p, axis=-1, keepdims=True)   # exact softmax (cost hidden)

    attn = jnp.einsum(
        "bqk,bkd->bqd",
        p.astype(jnp.bfloat16), v.astype(jnp.bfloat16),
        preferred_element_type=jnp.float32)                    # (BC, S, D)
    attn = attn.reshape(N, D)
    attn = jnp.dot(attn.astype(jnp.bfloat16), wo_ref[...],
                   preferred_element_type=jnp.float32) + bo

    # residual 1
    h2 = xf + attn

    # ---- LayerNorm2 + FFN ---------------------------------------------------
    hn = _layer_norm(h2, ln2_w, ln2_b)
    ff = jnp.dot(hn.astype(jnp.bfloat16), w1_ref[...],
                 preferred_element_type=jnp.float32) + b1
    ff = jnp.maximum(ff, 0.0)
    ff = jnp.dot(ff.astype(jnp.bfloat16), w2_ref[...],
                 preferred_element_type=jnp.float32) + b2

    # residual 2
    out_ref[...] = (h2 + ff).reshape(BC, S, D).astype(out_ref.dtype)


@functools.partial(jax.jit, static_argnames=("batch_chunks",))
def attention_layer(x, distances, params, batch_chunks=1):
    # batch_chunks=1 (default): single grid step — at this problem size the
    # kernel is launch/DMA-bound, so one fat step is fastest on v5e/v6e/v7x.
    # Only raise batch_chunks once BC*S per step reaches >=128-256 rows.
    B, S, D = x.shape
    H = params["b1"].shape[1]
    assert B % batch_chunks == 0, (B, batch_chunks)
    BC = B // batch_chunks

    const = lambda shape: pl.BlockSpec(shape, lambda b: (0,) * len(shape))

    in_specs = [
        pl.BlockSpec((BC, S, D), lambda b: (b, 0, 0)),   # x
        pl.BlockSpec((BC, S, S), lambda b: (b, 0, 0)),   # distances
        const((6, D)),                                   # packed LN weights + bo, b2
        const((1, 3 * D)),                               # packed q/k/v biases
        const((1, H)),                                   # FF b1
        const((D, 3 * D)),                               # fused Wqkv (bf16, q cols pre-scaled)
        const((D, D)),                                   # Wo (bf16)
        const((D, H)),                                   # FF W1 (bf16)
        const((H, D)),                                   # FF W2 (bf16)
    ]

    out = pl.pallas_call(
        attention_layer_kernel,
        out_shape=jax.ShapeDtypeStruct((B, S, D), x.dtype),
        grid_spec=pltpu.PrefetchScalarGridSpec(
            num_scalar_prefetch=0,
            grid=(batch_chunks,),
            in_specs=in_specs,
            out_specs=pl.BlockSpec((BC, S, D), lambda b: (b, 0, 0)),
        ),
        compiler_params=pltpu.CompilerParams(
            dimension_semantics=("arbitrary",)),
    )(
        x, distances,
        params["vecs"], params["bqkv"], params["b1"],
        params["wqkv"], params["wo"], params["w1"], params["w2"],
    )
    return out


def init_params(key):
    ks = jax.random.split(key, 6)
    s = 0.02
    D, H = EMB, HID

    wq = s * jax.random.normal(ks[0], (D, D), jnp.float32)
    wk = s * jax.random.normal(ks[1], (D, D), jnp.float32)
    wv = s * jax.random.normal(ks[2], (D, D), jnp.float32)
    wo = s * jax.random.normal(ks[3], (D, D), jnp.float32)
    w1 = s * jax.random.normal(ks[4], (D, H), jnp.float32)
    w2 = s * jax.random.normal(ks[5], (H, D), jnp.float32)

    ln1_w = jnp.ones((1, D), jnp.float32)
    ln1_b = jnp.zeros((1, D), jnp.float32)
    ln2_w = jnp.ones((1, D), jnp.float32)
    ln2_b = jnp.zeros((1, D), jnp.float32)
    bq = jnp.zeros((1, D), jnp.float32)
    bk = jnp.zeros((1, D), jnp.float32)
    bv = jnp.zeros((1, D), jnp.float32)
    bo = jnp.zeros((1, D), jnp.float32)
    b1 = jnp.zeros((1, H), jnp.float32)
    b2 = jnp.zeros((1, D), jnp.float32)

    # Fold the 1/sqrt(D) attention scale into the Q projection at init time
    # (one-time host-side change; removes a per-call (B,S,S) VPU multiply).
    scale = 1.0 / (D ** 0.5)
    wq_s = wq * scale
    bq_s = bq * scale

    # Packed operands (fewer pipeline operands; bf16 weights halve DMA bytes).
    vecs = jnp.concatenate(
        [ln1_w, ln1_b, ln2_w, ln2_b, bo, b2], axis=0)          # (6, D)  f32
    bqkv = jnp.concatenate([bq_s, bk, bv], axis=1)             # (1, 3D) f32
    wqkv = jnp.concatenate([wq_s, wk, wv], axis=1).astype(jnp.bfloat16)

    return {
        "vecs": vecs,
        "bqkv": bqkv,
        "b1": b1,
        "wqkv": wqkv,
        "wo": wo.astype(jnp.bfloat16),
        "w1": w1.astype(jnp.bfloat16),
        "w2": w2.astype(jnp.bfloat16),
    }


if __name__ == "__main__":
    key = jax.random.PRNGKey(0)
    kx, kd, kp = jax.random.split(key, 3)

    x = jax.random.normal(kx, (BATCH, SEQ, EMB), jnp.float32)
    distances = jnp.abs(jax.random.normal(kd, (BATCH, SEQ, SEQ), jnp.float32))
    params = init_params(kp)

    # Single grid step (batch_chunks=1): fastest on v5e/v6e/v7x at this size.
    out = attention_layer(x, distances, params, batch_chunks=1)
    out = jax.block_until_ready(out)
    assert out.shape == (BATCH, SEQ, EMB), out.shape
    assert bool(jnp.all(jnp.isfinite(out)))
    print("KERNEL_OK")
</pallas_src>

<mosaic_0001>
module attributes {stable_mosaic.version = 11 : i64} {
  func.func @attention_layer_kernel(%arg0: i32, %arg1: memref<2x8x128xf32, #tpu.memory_space<vmem>>, %arg2: memref<2x8x8xf32, #tpu.memory_space<vmem>>, %arg3: memref<6x128xf32, #tpu.memory_space<vmem>>, %arg4: memref<1x384xf32, #tpu.memory_space<vmem>>, %arg5: memref<1x512xf32, #tpu.memory_space<vmem>>, %arg6: memref<128x384xbf16, #tpu.memory_space<vmem>>, %arg7: memref<128x128xbf16, #tpu.memory_space<vmem>>, %arg8: memref<128x512xbf16, #tpu.memory_space<vmem>>, %arg9: memref<512x128xbf16, #tpu.memory_space<vmem>>, %arg10: memref<2x8x128xf32, #tpu.memory_space<vmem>>) attributes {dimension_semantics = [#tpu.dimension_semantics<arbitrary>], iteration_bounds = array<i64: 1>, scalar_prefetch = 0 : i64, scratch_operands = 0 : i64, tpu.core_type = #tpu.core_type<tc>, window_params = [{transform_indices = @transform_0, window_bounds = array<i64: 2, 8, 128>}, {transform_indices = @transform_1, window_bounds = array<i64: 2, 8, 8>}, {pipeline_mode = #tpu.pipeline_mode<synchronous>, transform_indices = @transform_2, window_bounds = array<i64: 6, 128>}, {pipeline_mode = #tpu.pipeline_mode<synchronous>, transform_indices = @transform_3, window_bounds = array<i64: 1, 384>}, {pipeline_mode = #tpu.pipeline_mode<synchronous>, transform_indices = @transform_4, window_bounds = array<i64: 1, 512>}, {pipeline_mode = #tpu.pipeline_mode<synchronous>, transform_indices = @transform_5, window_bounds = array<i64: 128, 384>}, {pipeline_mode = #tpu.pipeline_mode<synchronous>, transform_indices = @transform_6, window_bounds = array<i64: 128, 128>}, {pipeline_mode = #tpu.pipeline_mode<synchronous>, transform_indices = @transform_7, window_bounds = array<i64: 128, 512>}, {pipeline_mode = #tpu.pipeline_mode<synchronous>, transform_indices = @transform_8, window_bounds = array<i64: 512, 128>}, {transform_indices = @transform_9, window_bounds = array<i64: 2, 8, 128>}]} {
    %c0 = arith.constant 0 : index
    %c0_0 = arith.constant 0 : index
    %c0_1 = arith.constant 0 : index
    %0 = vector.load %arg1[%c0, %c0_0, %c0_1] : memref<2x8x128xf32, #tpu.memory_space<vmem>>, vector<2x8x128xf32>
    %c0_2 = arith.constant 0 : index
    %c0_3 = arith.constant 0 : index
    %c0_4 = arith.constant 0 : index
    %1 = vector.load %arg2[%c0_2, %c0_3, %c0_4] : memref<2x8x8xf32, #tpu.memory_space<vmem>>, vector<2x8x8xf32>
    %c0_5 = arith.constant 0 : index
    %c0_6 = arith.constant 0 : index
    %2 = vector.load %arg3[%c0_5, %c0_6] : memref<6x128xf32, #tpu.memory_space<vmem>>, vector<6x128xf32>
    %3 = vector.extract_strided_slice %2 {offsets = [0, 0], sizes = [1, 128], strides = [1, 1]} : vector<6x128xf32> to vector<1x128xf32>
    %4 = vector.extract_strided_slice %2 {offsets = [1, 0], sizes = [1, 128], strides = [1, 1]} : vector<6x128xf32> to vector<1x128xf32>
    %5 = vector.extract_strided_slice %2 {offsets = [2, 0], sizes = [1, 128], strides = [1, 1]} : vector<6x128xf32> to vector<1x128xf32>
    %6 = vector.extract_strided_slice %2 {offsets = [3, 0], sizes = [1, 128], strides = [1, 1]} : vector<6x128xf32> to vector<1x128xf32>
    %7 = vector.extract_strided_slice %2 {offsets = [4, 0], sizes = [1, 128], strides = [1, 1]} : vector<6x128xf32> to vector<1x128xf32>
    %8 = vector.extract_strided_slice %2 {offsets = [5, 0], sizes = [1, 128], strides = [1, 1]} : vector<6x128xf32> to vector<1x128xf32>
    %c0_7 = arith.constant 0 : index
    %c0_8 = arith.constant 0 : index
    %9 = vector.load %arg4[%c0_7, %c0_8] : memref<1x384xf32, #tpu.memory_space<vmem>>, vector<1x384xf32>
    %c0_9 = arith.constant 0 : index
    %c0_10 = arith.constant 0 : index
    %10 = vector.load %arg5[%c0_9, %c0_10] : memref<1x512xf32, #tpu.memory_space<vmem>>, vector<1x512xf32>
    %11 = vector.shape_cast %0 : vector<2x8x128xf32> to vector<16x128xf32>
    %cst = arith.constant dense<0.000000e+00> : vector<16xf32>
    %12 = vector.multi_reduction <add>, %11, %cst [1] : vector<16x128xf32> to vector<16xf32>
    %13 = vector.shape_cast %12 : vector<16xf32> to vector<16x1xf32>
    %cst_11 = arith.constant 1.280000e+02 : f32
    %14 = vector.broadcast %cst_11 : f32 to vector<16x1xf32>
    %15 = arith.divf %13, %14 : vector<16x1xf32>
    %16 = vector.broadcast %15 : vector<16x1xf32> to vector<16x128xf32>
    %17 = arith.subf %11, %16 : vector<16x128xf32>
    %18 = arith.mulf %17, %17 : vector<16x128xf32>
    %cst_12 = arith.constant dense<0.000000e+00> : vector<16xf32>
    %19 = vector.multi_reduction <add>, %18, %cst_12 [1] : vector<16x128xf32> to vector<16xf32>
    %20 = vector.shape_cast %19 : vector<16xf32> to vector<16x1xf32>
    %cst_13 = arith.constant 1.280000e+02 : f32
    %21 = vector.broadcast %cst_13 : f32 to vector<16x1xf32>
    %22 = arith.divf %20, %21 : vector<16x1xf32>
    %23 = vector.broadcast %15 : vector<16x1xf32> to vector<16x128xf32>
    %24 = arith.subf %11, %23 : vector<16x128xf32>
    %cst_14 = arith.constant 9.99999974E-6 : f32
    %25 = vector.broadcast %cst_14 : f32 to vector<16x1xf32>
    %26 = arith.addf %22, %25 : vector<16x1xf32>
    %27 = math.rsqrt %26 : vector<16x1xf32>
    %28 = vector.broadcast %27 : vector<16x1xf32> to vector<16x128xf32>
    %29 = arith.mulf %24, %28 : vector<16x128xf32>
    %30 = vector.broadcast %3 : vector<1x128xf32> to vector<16x128xf32>
    %31 = arith.mulf %29, %30 : vector<16x128xf32>
    %32 = vector.broadcast %4 : vector<1x128xf32> to vector<16x128xf32>
    %33 = arith.addf %31, %32 : vector<16x128xf32>
    %34 = arith.truncf %33 : vector<16x128xf32> to vector<16x128xbf16>
    %c0_15 = arith.constant 0 : index
    %c0_16 = arith.constant 0 : index
    %35 = vector.load %arg6[%c0_15, %c0_16] : memref<128x384xbf16, #tpu.memory_space<vmem>>, vector<128x384xbf16>
    %cst_17 = arith.constant dense<0.000000e+00> : vector<16x384xf32>
    %36 = tpu.matmul %34, %35, %cst_17 {dimension_numbers = #tpu.dot_dimension_numbers<[1], [0], [0], [1], [0, 0, 1, 1], [], []>} : vector<16x128xbf16>, vector<128x384xbf16>, vector<16x384xf32> -> vector<16x384xf32>
    %37 = vector.broadcast %9 : vector<1x384xf32> to vector<16x384xf32>
    %38 = arith.addf %36, %37 : vector<16x384xf32>
    %39 = vector.extract_strided_slice %38 {offsets = [0, 0], sizes = [16, 128], strides = [1, 1]} : vector<16x384xf32> to vector<16x128xf32>
    %40 = vector.shape_cast %39 : vector<16x128xf32> to vector<2x8x128xf32>
    %41 = vector.extract_strided_slice %38 {offsets = [0, 128], sizes = [16, 128], strides = [1, 1]} : vector<16x384xf32> to vector<16x128xf32>
    %42 = vector.shape_cast %41 : vector<16x128xf32> to vector<2x8x128xf32>
    %43 = vector.extract_strided_slice %38 {offsets = [0, 256], sizes = [16, 128], strides = [1, 1]} : vector<16x384xf32> to vector<16x128xf32>
    %44 = vector.shape_cast %43 : vector<16x128xf32> to vector<2x8x128xf32>
    %45 = arith.truncf %40 : vector<2x8x128xf32> to vector<2x8x128xbf16>
    %46 = arith.truncf %42 : vector<2x8x128xf32> to vector<2x8x128xbf16>
    "tpu.trace_start"() <{level = 10 : i32, message = "bqd,bkd->bqk"}> : () -> ()
    %cst_18 = arith.constant dense<0.000000e+00> : vector<2x8x8xf32>
    %47 = tpu.matmul %45, %46, %cst_18 {dimension_numbers = #tpu.dot_dimension_numbers<[2], [2], [1], [1], [0, 0, 0, 1, 1, 1], [0], [0]>} : vector<2x8x128xbf16>, vector<2x8x128xbf16>, vector<2x8x8xf32> -> vector<2x8x8xf32>
    "tpu.trace_stop"() : () -> ()
    %48 = arith.subf %47, %1 : vector<2x8x8xf32>
    %cst_19 = arith.constant dense<0xFF800000> : vector<2x8xf32>
    %49 = vector.multi_reduction <maximumf>, %48, %cst_19 [2] : vector<2x8x8xf32> to vector<2x8xf32>
    %50 = vector.shape_cast %49 : vector<2x8xf32> to vector<2x8x1xf32>
    %51 = vector.broadcast %50 : vector<2x8x1xf32> to vector<2x8x8xf32>
    %52 = arith.subf %48, %51 : vector<2x8x8xf32>
    %53 = math.exp %52 : vector<2x8x8xf32>
    %cst_20 = arith.constant dense<0.000000e+00> : vector<2x8xf32>
    %54 = vector.multi_reduction <add>, %53, %cst_20 [2] : vector<2x8x8xf32> to vector<2x8xf32>
    %55 = vector.shape_cast %54 : vector<2x8xf32> to vector<2x8x1xf32>
    %56 = vector.broadcast %55 : vector<2x8x1xf32> to vector<2x8x8xf32>
    %57 = arith.divf %53, %56 : vector<2x8x8xf32>
    %58 = arith.truncf %57 : vector<2x8x8xf32> to vector<2x8x8xbf16>
    %59 = arith.truncf %44 : vector<2x8x128xf32> to vector<2x8x128xbf16>
    "tpu.trace_start"() <{level = 10 : i32, message = "bqk,bkd->bqd"}> : () -> ()
    %cst_21 = arith.constant dense<0.000000e+00> : vector<2x8x128xf32>
    %60 = tpu.matmul %58, %59, %cst_21 {dimension_numbers = #tpu.dot_dimension_numbers<[2], [1], [1], [2], [0, 0, 0, 1, 1, 2], [0], [0]>} : vector<2x8x8xbf16>, vector<2x8x128xbf16>, vector<2x8x128xf32> -> vector<2x8x128xf32>
    "tpu.trace_stop"() : () -> ()
    %61 = vector.shape_cast %60 : vector<2x8x128xf32> to vector<16x128xf32>
    %62 = arith.truncf %61 : vector<16x128xf32> to vector<16x128xbf16>
    %c0_22 = arith.constant 0 : index
    %c0_23 = arith.constant 0 : index
    %63 = vector.load %arg7[%c0_22, %c0_23] : memref<128x128xbf16, #tpu.memory_space<vmem>>, vector<128x128xbf16>
    %cst_24 = arith.constant dense<0.000000e+00> : vector<16x128xf32>
    %64 = tpu.matmul %62, %63, %cst_24 {dimension_numbers = #tpu.dot_dimension_numbers<[1], [0], [0], [1], [0, 0, 1, 1], [], []>} : vector<16x128xbf16>, vector<128x128xbf16>, vector<16x128xf32> -> vector<16x128xf32>
    %65 = vector.broadcast %7 : vector<1x128xf32> to vector<16x128xf32>
    %66 = arith.addf %64, %65 : vector<16x128xf32>
    %67 = arith.addf %11, %66 : vector<16x128xf32>
    %cst_25 = arith.constant dense<0.000000e+00> : vector<16xf32>
    %68 = vector.multi_reduction <add>, %67, %cst_25 [1] : vector<16x128xf32> to vector<16xf32>
    %69 = vector.shape_cast %68 : vector<16xf32> to vector<16x1xf32>
    %cst_26 = arith.constant 1.280000e+02 : f32
    %70 = vector.broadcast %cst_26 : f32 to vector<16x1xf32>
    %71 = arith.divf %69, %70 : vector<16x1xf32>
    %72 = vector.broadcast %71 : vector<16x1xf32> to vector<16x128xf32>
    %73 = arith.subf %67, %72 : vector<16x128xf32>
    %74 = arith.mulf %73, %73 : vector<16x128xf32>
    %cst_27 = arith.constant dense<0.000000e+00> : vector<16xf32>
    %75 = vector.multi_reduction <add>, %74, %cst_27 [1] : vector<16x128xf32> to vector<16xf32>
    %76 = vector.shape_cast %75 : vector<16xf32> to vector<16x1xf32>
    %cst_28 = arith.constant 1.280000e+02 : f32
    %77 = vector.broadcast %cst_28 : f32 to vector<16x1xf32>
    %78 = arith.divf %76, %77 : vector<16x1xf32>
    %79 = vector.broadcast %71 : vector<16x1xf32> to vector<16x128xf32>
    %80 = arith.subf %67, %79 : vector<16x128xf32>
    %cst_29 = arith.constant 9.99999974E-6 : f32
    %81 = vector.broadcast %cst_29 : f32 to vector<16x1xf32>
    %82 = arith.addf %78, %81 : vector<16x1xf32>
    %83 = math.rsqrt %82 : vector<16x1xf32>
    %84 = vector.broadcast %83 : vector<16x1xf32> to vector<16x128xf32>
    %85 = arith.mulf %80, %84 : vector<16x128xf32>
    %86 = vector.broadcast %5 : vector<1x128xf32> to vector<16x128xf32>
    %87 = arith.mulf %85, %86 : vector<16x128xf32>
    %88 = vector.broadcast %6 : vector<1x128xf32> to vector<16x128xf32>
    %89 = arith.addf %87, %88 : vector<16x128xf32>
    %90 = arith.truncf %89 : vector<16x128xf32> to vector<16x128xbf16>
    %c0_30 = arith.constant 0 : index
    %c0_31 = arith.constant 0 : index
    %91 = vector.load %arg8[%c0_30, %c0_31] : memref<128x512xbf16, #tpu.memory_space<vmem>>, vector<128x512xbf16>
    %cst_32 = arith.constant dense<0.000000e+00> : vector<16x512xf32>
    %92 = tpu.matmul %90, %91, %cst_32 {dimension_numbers = #tpu.dot_dimension_numbers<[1], [0], [0], [1], [0, 0, 1, 1], [], []>} : vector<16x128xbf16>, vector<128x512xbf16>, vector<16x512xf32> -> vector<16x512xf32>
    %93 = vector.broadcast %10 : vector<1x512xf32> to vector<16x512xf32>
    %94 = arith.addf %92, %93 : vector<16x512xf32>
    %cst_33 = arith.constant 0.000000e+00 : f32
    %95 = vector.broadcast %cst_33 : f32 to vector<16x512xf32>
    %96 = arith.maximumf %94, %95 : vector<16x512xf32>
    %97 = arith.truncf %96 : vector<16x512xf32> to vector<16x512xbf16>
    %c0_34 = arith.constant 0 : index
    %c0_35 = arith.constant 0 : index
    %98 = vector.load %arg9[%c0_34, %c0_35] : memref<512x128xbf16, #tpu.memory_space<vmem>>, vector<512x128xbf16>
    %cst_36 = arith.constant dense<0.000000e+00> : vector<16x128xf32>
    %99 = tpu.matmul %97, %98, %cst_36 {dimension_numbers = #tpu.dot_dimension_numbers<[1], [0], [0], [1], [0, 0, 1, 1], [], []>} : vector<16x512xbf16>, vector<512x128xbf16>, vector<16x128xf32> -> vector<16x128xf32>
    %100 = vector.broadcast %8 : vector<1x128xf32> to vector<16x128xf32>
    %101 = arith.addf %99, %100 : vector<16x128xf32>
    %102 = arith.addf %67, %101 : vector<16x128xf32>
    %103 = vector.shape_cast %102 : vector<16x128xf32> to vector<2x8x128xf32>
    %c0_37 = arith.constant 0 : index
    %c0_38 = arith.constant 0 : index
    %c0_39 = arith.constant 0 : index
    %104 = vector.load %arg10[%c0_37, %c0_38, %c0_39] : memref<2x8x128xf32, #tpu.memory_space<vmem>>, vector<2x8x128xf32>
    tpu.vector_store %arg10[%c0_37, %c0_38, %c0_39], %103 {strides = array<i32>} : memref<2x8x128xf32, #tpu.memory_space<vmem>>, vector<2x8x128xf32>,
    return
  }
  func.func @transform_0(%arg0: i32) -> (i32, i32, i32) {
    %c0_i32 = arith.constant 0 : i32
    %c0_i32_0 = arith.constant 0 : i32
    %c0_i32_1 = arith.constant 0 : i32
    return %arg0, %c0_i32, %c0_i32_0 : i32, i32, i32
  }
  func.func @transform_1(%arg0: i32) -> (i32, i32, i32) {
    %c0_i32 = arith.constant 0 : i32
    %c0_i32_0 = arith.constant 0 : i32
    %c0_i32_1 = arith.constant 0 : i32
    return %arg0, %c0_i32, %c0_i32_0 : i32, i32, i32
  }
  func.func @transform_2(%arg0: i32) -> (i32, i32) {
    %c0_i32 = arith.constant 0 : i32
    %c0_i32_0 = arith.constant 0 : i32
    %c0_i32_1 = arith.constant 0 : i32
    return %c0_i32, %c0_i32_0 : i32, i32
  }
  func.func @transform_3(%arg0: i32) -> (i32, i32) {
    %c0_i32 = arith.constant 0 : i32
    %c0_i32_0 = arith.constant 0 : i32
    %c0_i32_1 = arith.constant 0 : i32
    return %c0_i32, %c0_i32_0 : i32, i32
  }
  func.func @transform_4(%arg0: i32) -> (i32, i32) {
    %c0_i32 = arith.constant 0 : i32
    %c0_i32_0 = arith.constant 0 : i32
    %c0_i32_1 = arith.constant 0 : i32
    return %c0_i32, %c0_i32_0 : i32, i32
  }
  func.func @transform_5(%arg0: i32) -> (i32, i32) {
    %c0_i32 = arith.constant 0 : i32
    %c0_i32_0 = arith.constant 0 : i32
    %c0_i32_1 = arith.constant 0 : i32
    return %c0_i32, %c0_i32_0 : i32, i32
  }
  func.func @transform_6(%arg0: i32) -> (i32, i32) {
    %c0_i32 = arith.constant 0 : i32
    %c0_i32_0 = arith.constant 0 : i32
    %c0_i32_1 = arith.constant 0 : i32
    return %c0_i32, %c0_i32_0 : i32, i32
  }
  func.func @transform_7(%arg0: i32) -> (i32, i32) {
    %c0_i32 = arith.constant 0 : i32
    %c0_i32_0 = arith.constant 0 : i32
    %c0_i32_1 = arith.constant 0 : i32
    return %c0_i32, %c0_i32_0 : i32, i32
  }
  func.func @transform_8(%arg0: i32) -> (i32, i32) {
    %c0_i32 = arith.constant 0 : i32
    %c0_i32_0 = arith.constant 0 : i32
    %c0_i32_1 = arith.constant 0 : i32
    return %c0_i32, %c0_i32_0 : i32, i32
  }
  func.func @transform_9(%arg0: i32) -> (i32, i32, i32) {
    %c0_i32 = arith.constant 0 : i32
    %c0_i32_0 = arith.constant 0 : i32
    %c0_i32_1 = arith.constant 0 : i32
    return %arg0, %c0_i32, %c0_i32_0 : i32, i32, i32
  }
}

</mosaic_0001>

<bundles_post_ra>
// kernel: attention_layer.1
= control target key start
LH: loop header
LB: loop body
LE: loop exit
PB: predicated region body
PF: predicated region fallthrough
CT: control target
= control target key end

     0   :  { %14 = vsyncpa [#allocation3], 0  ;;  %s2287_s0 = inlined_call_operand.hbm [shape: f32[2,8,128], index: 0, kind: input, shape index: {}]   ;;  %s2288_s1 = inlined_call_operand.hbm [shape: f32[2,8,8], index: 1, kind: input, shape index: {}]   ;;  %s2289_s2 = inlined_call_operand.hbm [shape: f32[6,128], index: 2, kind: input, shape index: {}]   ;;  %s2290_s3 = inlined_call_operand.vmem [shape: f32[1,384], index: 3, kind: input, shape index: {}]   ;;  %s2291_s4 = inlined_call_operand.hbm [shape: f32[1,512], index: 4, kind: input, shape index: {}]   ;;  %s2292_s5 = inlined_call_operand.hbm [shape: bf16[128,384], index: 5, kind: input, shape index: {}]   ;;  %s2293_s6 = inlined_call_operand.hbm [shape: bf16[128,128], index: 6, kind: input, shape index: {}]   ;;  %s2294_s7 = inlined_call_operand.hbm [shape: bf16[128,512], index: 7, kind: input, shape index: {}]   ;;  %s2295_s8 = inlined_call_operand.hbm [shape: bf16[512,128], index: 8, kind: input, shape index: {}]   ;;  %s2296_s9 = inlined_call_operand.hbm [shape: f32[2,8,128], index: 9, kind: output, shape index: {}]  }
   0x1   :  { %15 = vsyncpa [#allocation6], 0 }
   0x2   :  { %16 = vsyncpa [#allocation9], 0 }
   0x3   :  { %17 = vsyncpa [#allocation12], 0 }
   0x4   :  { %18 = vsyncpa [#allocation15], 0 }
   0x5   :  { %19 = vsyncpa [#allocation4], 0  ;;  %s2053_s30 = smov [#allocation5]   ;;  %s2054_s11 = smov [#allocation8]  }
   0x6   :  { %s37_s10 = sshll.u32 %s2053_s30, 4  ;;  %s62_s12 = sshll.u32 %s2054_s11, 4  ;;  %s38_s10 = int_to_ptr.vmem [resolvable:$true] %s37_s10  ;;  %s63_s12 = int_to_ptr.vmem [resolvable:$true] %s62_s12 }
   0x7   :  { %s1869_s13 = scalar_lea.vmem %s38_s10, 256  ;;  %p1874_p1 = scmp.lt.s32.totalorder %s38_s10, %s38_s10 }
   0x8   :  { %p1870_p0 = scmp.ne.s32.totalorder %s38_s10, %s1869_s13  ;;  %p1875_p2 = scmp.lt.s32.totalorder %s1869_s13, %s1869_s13 }
   0xa   :  { %p1876_p3 = por %p1875_p2, %p1874_p1 }
   0xc   :  { %p1877_p4 = pnand %p1876_p3, %p1870_p0 }
   0xe   :  { %1880 = shalt.err (!%p1877_p4)
}
   0xf   :  { %s2055_s14 = smov 128   ;;  %s2056_s15 = smov 8  }
  0x10   :  { %43 = dma.hbm_to_vmem [thread:$0]  %s2288_s1, 256, %s38_s10, [#allocation6], %s2055_s14, %s2055_s14, %s2056_s15  }
  0x11   :  { %s1889_s18 = scalar_lea.vmem %s63_s12, 64  ;;  %p1894_p6 = scmp.lt.s32.totalorder %s63_s12, %s63_s12 }
  0x12   :  { %p1890_p5 = scmp.ne.s32.totalorder %s63_s12, %s1889_s18  ;;  %p1895_p7 = scmp.lt.s32.totalorder %s1889_s18, %s1889_s18 }
  0x14   :  { %p1896_p8 = por %p1895_p7, %p1894_p6 }
  0x16   :  { %p1897_p9 = pnand %p1896_p8, %p1890_p5 }
  0x18   :  { %1900 = shalt.err (!%p1897_p9)
}
  0x19   :  { %65 = dma.hbm_to_vmem [thread:$0]  %s2291_s4, 64, %s63_s12, [#allocation9]  }
  0x1a   :  { %s2057_s21 = smov [#allocation11]  }
  0x1b   :  { %s83_s22 = sshll.u32 %s2057_s21, 4  ;;  %s84_s22 = int_to_ptr.vmem [resolvable:$true] %s83_s22 }
  0x1c   :  { %s1909_s23 = scalar_lea.vmem %s84_s22, 1024  ;;  %p1914_p11 = scmp.lt.s32.totalorder %s84_s22, %s84_s22 }
  0x1d   :  { %p1910_p10 = scmp.ne.s32.totalorder %s84_s22, %s1909_s23  ;;  %p1915_p12 = scmp.lt.s32.totalorder %s1909_s23, %s1909_s23 }
  0x1f   :  { %p1916_p13 = por %p1915_p12, %p1914_p11 }
  0x21   :  { %p1917_p0 = pnand %p1916_p13, %p1910_p10 }
  0x23   :  { %1920 = shalt.err (!%p1917_p0)
}
  0x24   :  { %s2058_s1 = smov 64   ;;  %s2059_s24 = smov 4  }
  0x25   :  { %89 = dma.hbm_to_vmem [thread:$0]  %s2293_s6, 1024, %s84_s22, [#allocation12], %s2058_s1, %s2058_s1, %s2059_s24  }
  0x26   :  { %s2060_s4 = smov [#allocation2]   ;;  %s2061_s28 = smov [#allocation7]  }
  0x27   :  { %s25_s27 = sshll.u32 %s2060_s4, 4  ;;  %s50_s29 = sshll.u32 %s2061_s28, 4  ;;  %s26_s27 = int_to_ptr.vmem [resolvable:$true] %s25_s27  ;;  %s51_s29 = int_to_ptr.vmem [resolvable:$true] %s50_s29 }
  0x28   :  { %s1929_s30 = scalar_lea.vmem %s26_s27, 256  ;;  %p1934_p2 = scmp.lt.s32.totalorder %s26_s27, %s26_s27 }
  0x29   :  { %p1930_p1 = scmp.ne.s32.totalorder %s26_s27, %s1929_s30  ;;  %p1935_p3 = scmp.lt.s32.totalorder %s1929_s30, %s1929_s30 }
  0x2b   :  { %p1936_p4 = por %p1935_p3, %p1934_p2 }
  0x2d   :  { %p1937_p5 = pnand %p1936_p4, %p1930_p1 }
  0x2f   :  { %1940 = shalt.err (!%p1937_p5)
}
  0x30   :  { %31 = dma.hbm_to_vmem [thread:$0]  %s2287_s0, 256, %s26_s27, [#allocation3], %s2055_s14, %s2055_s14, %s2056_s15  }
  0x31   :  { %s1949_s6 = scalar_lea.vmem %s51_s29, 128  ;;  %p1954_p7 = scmp.lt.s32.totalorder %s51_s29, %s51_s29 }
  0x32   :  { %p1950_p6 = scmp.ne.s32.totalorder %s51_s29, %s1949_s6  ;;  %p1955_p8 = scmp.lt.s32.totalorder %s1949_s6, %s1949_s6 }
  0x34   :  { %p1956_p9 = por %p1955_p8, %p1954_p7 }
  0x36   :  { %p1957_p10 = pnand %p1956_p9, %p1950_p6 }
  0x38   :  { %1960 = shalt.err (!%p1957_p10)
}
  0x39   :  { %53 = dma.hbm_to_vmem [thread:$0]  %s2289_s2, 128, %s51_s29, [#allocation6]  }
  0x3a   :  { %s2062_s16 = smov [#allocation10]  }
  0x3b   :  { %s71_s17 = sshll.u32 %s2062_s16, 4  ;;  %s72_s17 = int_to_ptr.vmem [resolvable:$true] %s71_s17 }
  0x3c   :  { %s1969_s18 = scalar_lea.vmem %s72_s17, 3072  ;;  %p1974_p12 = scmp.lt.s32.totalorder %s72_s17, %s72_s17 }
  0x3d   :  { %p1970_p11 = scmp.ne.s32.totalorder %s72_s17, %s1969_s18  ;;  %p1975_p13 = scmp.lt.s32.totalorder %s1969_s18, %s1969_s18 }
  0x3f   :  { %p1976_p0 = por %p1975_p13, %p1974_p12 }
  0x41   :  { %p1977_p1 = pnand %p1976_p0, %p1970_p11 }
  0x43   :  { %1980 = shalt.err (!%p1977_p1)
}
  0x44   :  { %s2063_s0 = smov 192   ;;  %s2064_s19 = smov 12  }
  0x45   :  { %77 = dma.hbm_to_vmem [thread:$0]  %s2292_s5, 3072, %s72_s17, [#allocation9], %s2063_s0, %s2063_s0, %s2064_s19  }
  0x46   :  { %s2065_s22 = smov [#allocation13]  }
  0x47   :  { %s95_s23 = sshll.u32 %s2065_s22, 4  ;;  %s96_s23 = int_to_ptr.vmem [resolvable:$true] %s95_s23 }
  0x48   :  { %s1989_s2 = scalar_lea.vmem %s96_s23, 4096  ;;  %p1994_p3 = scmp.lt.s32.totalorder %s96_s23, %s96_s23 }
  0x49   :  { %p1990_p2 = scmp.ne.s32.totalorder %s96_s23, %s1989_s2  ;;  %p1995_p4 = scmp.lt.s32.totalorder %s1989_s2, %s1989_s2 }
  0x4b   :  { %p1996_p5 = por %p1995_p4, %p1994_p3 }
  0x4d   :  { %p1997_p6 = pnand %p1996_p5, %p1990_p2 }
  0x4f   :  { %2000 = shalt.err (!%p1997_p6)
}
  0x50   :  { %s2066_s25 = smov 256   ;;  %s2067_s26 = smov 16  }
  0x51   :  { %101 = dma.hbm_to_vmem [thread:$0]  %s2294_s7, 4096, %s96_s23, [#allocation12], %s2066_s25, %s2066_s25, %s2067_s26  }
  0x52   :  { %s2068_s28 = smov [#allocation14]  }
  0x53   :  { %s107_s29 = sshll.u32 %s2068_s28, 4  ;;  %s108_s29 = int_to_ptr.vmem [resolvable:$true] %s107_s29 }
  0x54   :  { %s2009_s5 = scalar_lea.vmem %s108_s29, 4096  ;;  %p2014_p8 = scmp.lt.s32.totalorder %s108_s29, %s108_s29 }
  0x55   :  { %p2010_p7 = scmp.ne.s32.totalorder %s108_s29, %s2009_s5  ;;  %p2015_p9 = scmp.lt.s32.totalorder %s2009_s5, %s2009_s5 }
  0x57   :  { %p2016_p10 = por %p2015_p9, %p2014_p8 }
  0x59   :  { %p2017_p11 = pnand %p2016_p10, %p2010_p7 }
  0x5b   :  { %2020 = shalt.err (!%p2017_p11)
}
  0x5c   :  { %113 = dma.hbm_to_vmem [thread:$0]  %s2295_s8, 4096, %s108_s29, [#allocation15], %s2058_s1, %s2058_s1, %s2059_s24  }
  0x5d   :  { %2041 = dma.done.wait [#allocation3], 256  }
  0x5e   :  { %2042 = vsyncadd [#allocation3], 4294967040 }
  0x5f   :  { %2043 = dma.done.wait [#allocation6], 384  }
  0x60   :  { %2044 = vsyncadd [#allocation6], 4294966912 }
  0x61   :  { %2045 = dma.done.wait [#allocation9], 3136  }
  0x62   :  { %2046 = vsyncadd [#allocation9], 4294964160 }
  0x63   :  { %2047 = dma.done.wait [#allocation12], 5120  }
  0x64   :  { %2048 = vsyncadd [#allocation12], 4294962176 }
  0x65   :  { %2049 = dma.done.wait [#allocation15], 4096  }
  0x66   :  { %2050 = vsyncadd [#allocation15], 4294963200  ;;  %v2159_v0 = vld [vmem:[#allocation2] sm:$0xff]  ;;  %v2161_v1 = vld [vmem:[#allocation2 + $0x8] sm:$0xff]  ;;  %v2069_v4 = vmov 0.0   ;;  %v2070_v27 = vmov 0   ;;  %v169_v42 = vlaneseq }
  0x67   :  { %146 = vadd.xlane.f32.xlu0 %v2159_v0  ;;  %v1725_v2 = vld [vmem:[#allocation10 + $0xac] ss:$12 sps:$4 sm:$0xff]   ;;  %v1727_v3 = vld [vmem:[#allocation10 + $0xa8] ss:$12 sps:$4 sm:$0xff]   ;;  %1641 = vmatprep.subr.bf16.mxu1 %v2069_v4  ;;  %v1728_v5 = vld [vmem:[#allocation10 + $0xb0] ss:$12 sps:$4 sm:$0xff]  }
  0x68   :  { %358 = vmatprep.subr.bf16.mxu0 %v1725_v2  ;;  %1642 = vmatpush3.bf16.msra.mxu1 %v1728_v5  ;;  %v1729_v14 = vld [vmem:[#allocation10 + $0x94] ss:$12 sps:$4 sm:$0xff]   ;;  %v1731_v15 = vld [vmem:[#allocation10 + $0x90] ss:$12 sps:$4 sm:$0xff]   ;;  %v1732_v16 = vld [vmem:[#allocation10 + $0x98] ss:$12 sps:$4 sm:$0xff]  }
  0x69   :  { %359 = vmatpush1.bf16.msra.mxu0 %v1727_v3  ;;  %1643 = vmatprep.subr.bf16.mxu1 %v2069_v4  ;;  %v1733_v17 = vld [vmem:[#allocation10 + $0x7c] ss:$12 sps:$4 sm:$0xff]   ;;  %v1735_v18 = vld [vmem:[#allocation10 + $0x78] ss:$12 sps:$4 sm:$0xff]   ;;  %v1736_v19 = vld [vmem:[#allocation10 + $0x80] ss:$12 sps:$4 sm:$0xff]  }
  0x6a   :  { %360 = vmatprep.subr.bf16.mxu0 %v1729_v14  ;;  %v1737_v20 = vld [vmem:[#allocation10 + $0x64] ss:$12 sps:$4 sm:$0xff]   ;;  %v1739_v21 = vld [vmem:[#allocation10 + $0x60] ss:$12 sps:$4 sm:$0xff]   ;;  %v1740_v22 = vld [vmem:[#allocation10 + $0x68] ss:$12 sps:$4 sm:$0xff]   ;;  %390 = vmatprep.mubr.bf16.mxu0 %v2070_v27 }
  0x6b   :  { %148 = vadd.xlane.f32.xlu0 %v2161_v1  ;;  %v1741_v23 = vld [vmem:[#allocation10 + $0x4c] ss:$12 sps:$4 sm:$0xff]   ;;  %v1743_v24 = vld [vmem:[#allocation10 + $0x48] ss:$12 sps:$4 sm:$0xff]   ;;  %v1744_v25 = vld [vmem:[#allocation10 + $0x50] ss:$12 sps:$4 sm:$0xff]  }
  0x6c   :  { %1644 = vmatpush3.bf16.msra.mxu1 %v1732_v16  ;;  %v1745_v26 = vld [vmem:[#allocation10 + $0x34] ss:$12 sps:$4 sm:$0xff]   ;;  %vm2071_vm0 = vmmov 0   ;;  %v1747_v28 = vld [vmem:[#allocation10 + $0x30] ss:$12 sps:$4 sm:$0xff]   ;;  %v2188_v43 = vshrl.u32 %v169_v42, 7 }
  0x6d   :  { %361 = vmatpush1.bf16.msra.mxu0 %v1731_v15  ;;  %1645 = vmatprep.subr.bf16.mxu1 %v2069_v4  ;;  %v1748_v29 = vld [vmem:[#allocation10 + $0x38] ss:$12 sps:$4 sm:$0xff]   ;;  %v1749_v30 = vld [vmem:[#allocation10 + $0x1c] ss:$12 sps:$4 sm:$0xff]   ;;  %v1752_v32 = vld [vmem:[#allocation10 + $0x20] ss:$12 sps:$4 sm:$0xff]  }
  0x6e   :  { %362 = vmatprep.subr.bf16.mxu0 %v1733_v17  ;;  %1657 = vmatprep.mubr.msk.bf16.mxu1 %vm2071_vm0, %v2069_v4  ;;  %v1751_v31 = vld [vmem:[#allocation10 + $0x18] ss:$12 sps:$4 sm:$0xff]   ;;  %v1755_v34 = vld [vmem:[#allocation10] ss:$12 sps:$4 sm:$0xff]   ;;  %v1756_v35 = vld [vmem:[#allocation10 + $0x8] ss:$12 sps:$4 sm:$0xff]  }
  0x6f   :  { %v1753_v33 = vld [vmem:[#allocation10 + $0x4] ss:$12 sps:$4 sm:$0xff]   ;;  %v2191_v44 = vsub.s32 0, %v2188_v43  ;;  %v2193_v45 = vld [vmem:[#allocation7] sm:$0x3f]  ;;  %v2199_v49 = vsub.s32 1, %v2188_v43 }
  0x70   :  { %1646 = vmatpush3.bf16.msra.mxu1 %v1736_v19  ;;  %v144_v58 = vld [vmem:[%s2290_s3] sm:$0x7]  ;;  %v2212_v59 = vsub.s32 2, %v2188_v43  ;;  %vm558_vm1 = vcmask 1043456   ;;  %vm528_vm2 = vcmask 64512   ;;  %s2072_s3 = smov [#allocation16]  }
  0x71   :  { %363 = vmatpush1.bf16.msra.mxu0 %v1735_v18  ;;  %1647 = vmatprep.subr.bf16.mxu1 %v2069_v4  ;;  %v172_v48 = vrot.slane %v2193_v45, %v2191_v44  ;;  %v178_v53 = vrot.slane %v2193_v45, %v2199_v49  ;;  %v222_v60 = vrot.slane %v144_v58, %v2199_v49  ;;  %s1457_s1 = sshll.u32 %s2072_s3, 4  ;;  %s1458_s1 = int_to_ptr.vmem [resolvable:$true] %s1457_s1 }
  0x72   :  { %364 = vmatprep.subr.bf16.mxu0 %v1737_v20  ;;  %v226_v3 = vrot.slane %v144_v58, %v2212_v59  ;;  %s2021_s24 = scalar_lea.vmem %s1458_s1, 256  ;;  %p2026_p13 = scmp.lt.s32.totalorder %s1458_s1, %s1458_s1 }
  0x73   :  { %p2022_p12 = scmp.ne.s32.totalorder %s1458_s1, %s2021_s24  ;;  %p2027_p0 = scmp.lt.s32.totalorder %s2021_s24, %s2021_s24 }
  0x74   :  { %1648 = vmatpush3.bf16.msra.mxu1 %v1740_v22 }
  0x75   :  { %365 = vmatpush1.bf16.msra.mxu0 %v1739_v21  ;;  %1649 = vmatprep.subr.bf16.mxu1 %v2069_v4  ;;  %p2028_p1 = por %p2027_p0, %p2026_p13 }
  0x76   :  { %366 = vmatprep.subr.bf16.mxu0 %v1741_v23 }
  0x77   :  { %p2029_p2 = pnand %p2028_p1, %p2022_p12 }
  0x78   :  { %1650 = vmatpush3.bf16.msra.mxu1 %v1744_v25 }
  0x79   :  { %367 = vmatpush1.bf16.msra.mxu0 %v1743_v24  ;;  %1651 = vmatprep.subr.bf16.mxu1 %v2069_v4  ;;  %v141_v24 = vld [vmem:[#allocation5] sm:$0xff] }
  0x7a   :  { %368 = vmatprep.subr.bf16.mxu0 %v1745_v26 }
  0x7c   :  { %1652 = vmatpush3.bf16.msra.mxu1 %v1748_v29 }
  0x7d   :  { %369 = vmatpush1.bf16.msra.mxu0 %v1747_v28  ;;  %1653 = vmatprep.subr.bf16.mxu1 %v2069_v4 }
  0x7e   :  { %370 = vmatprep.subr.bf16.mxu0 %v1749_v30 }
  0x80   :  { %1654 = vmatpush3.bf16.msra.mxu1 %v1752_v32  ;;  %v142_v32 = vld [vmem:[#allocation5 + $0x8] sm:$0xff] }
  0x81   :  { %371 = vmatpush1.bf16.msra.mxu0 %v1751_v31  ;;  %1655 = vmatprep.subr.bf16.mxu1 %v2069_v4 }
  0x82   :  { %372 = vmatprep.subr.bf16.mxu0 %v1753_v33 }
  0x84   :  { %1656 = vmatpush3.bf16.msra.mxu1 %v1756_v35 }
  0x85   :  { %373 = vmatpush1.bf16.msra.mxu0 %v1755_v34  ;;  %1661 = vmatprep.subr.bf16.mxu1 %v2069_v4 }
  0x86   :  { %1685 = vmatprep.subr.bf16.mxu0 %v2069_v4 }
  0xf0   :  { %v147_v6 = vpop.xlane.xlu0 %146 }
  0xf1   :  { %v151_v7 = vmul.f32 0.0078125, %v147_v6  ;;  %v218_v6 = vrot.slane %v144_v58, %v2191_v44 }
  0xf3   :  { %v2168_v8 = vsub.f32 %v2159_v0, %v151_v7 }
  0xf4   :  { %v149_v9 = vpop.xlane.xlu0 %148 }
  0xf5   :  { %v152_v10 = vmul.f32 0.0078125, %v149_v9  ;;  %v155_v11 = vmul.f32 %v2168_v8, %v2168_v8 }
  0xf7   :  { %v2173_v12 = vsub.f32 %v2161_v1, %v152_v10  ;;  %157 = vadd.xlane.f32.xlu1 %v155_v11 }
  0xf9   :  { %v156_v13 = vmul.f32 %v2173_v12, %v2173_v12 }
  0xfb   :  { %159 = vadd.xlane.f32.xlu1 %v156_v13 }
 0x180   :  { %v158_v36 = vpop.xlane.xlu1 %157 }
 0x181   :  { %v161_v37 = vmul.f32 0.0078125, %v158_v36 }
 0x183   :  { %v163_v38 = vadd.f32 1e-05, %v161_v37 }
 0x184   :  { %v160_v39 = vpop.xlane.xlu1 %159 }
 0x185   :  { %1845 = vrsqrt.f32 %v163_v38  ;;  %v162_v40 = vmul.f32 0.0078125, %v160_v39 }
 0x187   :  { %v164_v41 = vadd.f32 1e-05, %v162_v40 }
 0x189   :  { %1847 = vrsqrt.f32 %v164_v41 }
 0x192   :  { %v1846_v46 = vpop.eup %1845 }
 0x193   :  { %v167_v47 = vmul.f32 %v1846_v46, %v2168_v8 }
 0x195   :  { %v173_v52 = vmul.f32 %v172_v48, %v167_v47 }
 0x196   :  { %v1848_v50 = vpop.eup %1847 }
 0x197   :  { %v168_v51 = vmul.f32 %v1848_v50, %v2173_v12  ;;  %v179_v55 = vadd.f32 %v178_v53, %v173_v52 }
 0x199   :  { %v174_v54 = vmul.f32 %v172_v48, %v168_v51 }
 0x19b   :  { %v180_v56 = vadd.f32 %v178_v53, %v174_v54  ;;  %v1757_v53 = vld [vmem:[#allocation11 + $0x38] sm:$0xff]   ;;  %v1758_v54 = vld [vmem:[#allocation11 + $0x30] sm:$0xff]  }
 0x19d   :  { %v181_v57 = vpack.c.bf16 %v180_v56, %v179_v55  ;;  %v1759_v55 = vld [vmem:[#allocation11 + $0x28] sm:$0xff]   ;;  %v1760_v56 = vld [vmem:[#allocation11 + $0x20] sm:$0xff]  }
 0x19f   :  { %391 = vmatmul.mubr.bf16.vlgmr.msra.gmra.mxu0 %v181_v57  ;;  %1658 = vmatmul.mubr.bf16.vlgmr.msra.gmra.mxu1 %v181_v57  ;;  %v1761_v57 = vld [vmem:[#allocation11 + $0x18] sm:$0xff]  }
 0x1a0   :  { %1663 = vmatprep.mubr.msk.bf16.mxu1 %vm2071_vm0, %v2069_v4  ;;  %1701 = vmatprep.mubr.msk.bf16.mxu0 %vm2071_vm0, %v2069_v4 }
 0x1a1   :  { %1686 = vmatpush3.bf16.msra.mxu0 %v1757_v53  ;;  %v1791_v53 = vld [vmem:[#allocation13 + $0x64] ss:$16 sps:$4 sm:$0xff]  }
 0x1a2   :  { %1687 = vmatprep.subr.bf16.mxu0 %v2069_v4 }
 0x1a5   :  { %1688 = vmatpush3.bf16.msra.mxu0 %v1758_v54  ;;  %v1794_v54 = vld [vmem:[#allocation13 + $0x6c] ss:$16 sps:$4 sm:$0xff]  }
 0x1a6   :  { %1689 = vmatprep.subr.bf16.mxu0 %v2069_v4 }
 0x1a9   :  { %1690 = vmatpush3.bf16.msra.mxu0 %v1759_v55  ;;  %v1789_v55 = vld [vmem:[#allocation13 + $0x60] ss:$16 sps:$4 sm:$0xff]  }
 0x1aa   :  { %1691 = vmatprep.subr.bf16.mxu0 %v2069_v4 }
 0x1ad   :  { %1692 = vmatpush3.bf16.msra.mxu0 %v1760_v56  ;;  %v1792_v56 = vld [vmem:[#allocation13 + $0x68] ss:$16 sps:$4 sm:$0xff]  }
 0x1ae   :  { %1693 = vmatprep.subr.bf16.mxu0 %v2069_v4 }
 0x1b1   :  { %1694 = vmatpush3.bf16.msra.mxu0 %v1761_v57  ;;  %v1797_v57 = vld [vmem:[#allocation13 + $0x44] ss:$16 sps:$4 sm:$0xff]  }
 0x1b2   :  { %1695 = vmatprep.subr.bf16.mxu0 %v2069_v4 }
 0x25f   :  { %v392_v61 = vpop.f32.mrf.mxu0  ;;  %v435_v62 = vpop.f32.mrf.mxu1 }
 0x260   :  { %v393_v14 = vadd.f32 %v392_v61, %v218_v6  ;;  %v436_v19 = vadd.f32 %v435_v62, %v226_v3 }
 0x261   :  { %v394_v63 = vpop.f32.mrf.mxu0  ;;  %v1659_v2 = vpop.f32.mrf.mxu1 }
 0x262   :  { %v395_v5 = vadd.f32 %v394_v63, %v222_v60  ;;  %v442_v17 = vpack.c.bf16 %v393_v14, %v393_v14  ;;  %v553_v21 = vpack.c.bf16 %v436_v19, %v436_v19 }
 0x263   :  { %v396_v7 = vpop.f32.mrf.mxu0  ;;  %v438_v8 = vpop.f32.mrf.mxu1 }
 0x264   :  { %v444_v9 = vpack.c.bf16 %v395_v5, %v395_v5  ;;  %v439_v10 = vadd.f32 %v438_v8, %v226_v3  ;;  %v397_v20 = vadd.f32 %v396_v7, %v218_v6  ;;  %v560_v23 = vsel %vm558_vm1, %v553_v21, 0  ;;  %v1762_v6 = vld [vmem:[#allocation11 + $0x10] sm:$0xff]   ;;  %v1763_v7 = vld [vmem:[#allocation11 + $0x8] sm:$0xff]   ;;  %v1764_v8 = vld [vmem:[#allocation11] sm:$0xff]  }
 0x265   :  { %v398_v11 = vpop.f32.mrf.mxu0  ;;  %v1660_v12 = vpop.f32.mrf.mxu1  ;;  %1696 = vmatpush3.bf16.msra.mxu0 %v1762_v6  ;;  %v1812_v6 = vld [vmem:[#allocation13 + $0xc] ss:$16 sps:$4 sm:$0xff]  }
 0x266   :  { %v554_v13 = vpack.c.bf16 %v439_v10, %v439_v10  ;;  %1662 = vmatpush3.bf16.xpose.msra.mxu1 %v444_v9  ;;  %v399_v16 = vadd.f32 %v398_v11, %v222_v60  ;;  %v443_v22 = vpack.c.bf16 %v397_v20, %v397_v20  ;;  %1697 = vmatprep.subr.bf16.mxu0 %v2069_v4 }
 0x267   :  { %1667 = vmatprep.subr.bf16.mxu1 %v2069_v4 }
 0x268   :  { %v2218_v15 = vsel %vm558_vm1, %v554_v13, 0  ;;  %v445_v18 = vpack.c.bf16 %v399_v16, %v399_v16 }
 0x269   :  { %1698 = vmatpush3.bf16.msra.mxu0 %v1763_v7  ;;  %v1807_v7 = vld [vmem:[#allocation13] ss:$16 sps:$4 sm:$0xff]  }
 0x26a   :  { %1699 = vmatprep.subr.bf16.mxu0 %v2069_v4 }
 0x26d   :  { %1664 = vmatmul.mubr.bf16.vlgmr.msra.gmra.mxu1 %v442_v17  ;;  %1700 = vmatpush3.bf16.msra.mxu0 %v1764_v8  ;;  %v1810_v8 = vld [vmem:[#allocation13 + $0x8] ss:$16 sps:$4 sm:$0xff]  }
 0x26e   :  { %1668 = vmatpush3.bf16.xpose.msra.mxu1 %v445_v18  ;;  %1669 = vmatprep.mubr.msk.bf16.mxu1 %vm2071_vm0, %v2069_v4  ;;  %v667_v18 = vsub.s32 4, %v2188_v43 }
 0x26f   :  { %1673 = vmatprep.subr.bf16.mxu1 %v2069_v4 }
 0x270   :  { %v668_v19 = vrot.slane %v2193_v45, %v667_v18  ;;  %v785_v18 = vrot.slane %v2193_v45, %v2212_v59 }
 0x275   :  { %1670 = vmatmul.mubr.bf16.vlgmr.msra.gmra.mxu1 %v443_v22 }
 0x276   :  { %1674 = vmatpush3.bf16.msra.mxu1 %v560_v23  ;;  %1675 = vmatprep.mubr.msk.bf16.mxu1 %vm2071_vm0, %v2069_v4 }
 0x277   :  { %1679 = vmatprep.subr.bf16.mxu1 %v2069_v4 }
 0x32d   :  { %v480_v25 = vpop.f32.mrf.mxu1 }
 0x32e   :  { %v526_v26 = vsub.f32 %v480_v25, %v141_v24 }
 0x32f   :  { %v1665_v28 = vpop.f32.mrf.mxu1 }
 0x330   :  { %v529_v29 = vsel %vm528_vm2, %v526_v26, -inf  ;;  %v1767_v28 = vld [vmem:[#allocation13 + $0xe4] ss:$16 sps:$4 sm:$0xff]  }
 0x331   :  { %530 = vmax.xlane.f32.xlu0 %v529_v29  ;;  %v483_v30 = vpop.f32.mrf.mxu1  ;;  %v1768_v29 = vld [vmem:[#allocation13 + $0xe8] ss:$16 sps:$4 sm:$0xff]  }
 0x332   :  { %v1770_v30 = vld [vmem:[#allocation13 + $0xec] ss:$16 sps:$4 sm:$0xff]  }
 0x333   :  { %v1666_v31 = vpop.f32.mrf.mxu1  ;;  %1051 = vmatprep.subr.bf16.mxu0 %v1770_v30  ;;  %v1816_v30 = vld [vmem:[#allocation14 + $0xb8] sm:$0xff]  }
 0x335   :  { %v520_v33 = vpop.f32.mrf.mxu1 }
 0x336   :  { %v527_v34 = vsub.f32 %v520_v33, %v142_v32 }
 0x337   :  { %v1671_v35 = vpop.f32.mrf.mxu1 }
 0x338   :  { %v532_v36 = vsel %vm528_vm2, %v527_v34, -inf }
 0x339   :  { %533 = vmax.xlane.f32.xlu1 %v532_v36  ;;  %v523_v37 = vpop.f32.mrf.mxu1 }
 0x33a   :  { %v1773_v37 = vld [vmem:[#allocation13 + $0xc4] ss:$16 sps:$4 sm:$0xff]  }
 0x33b   :  { %v1672_v38 = vpop.f32.mrf.mxu1 }
 0x33c   :  { %v1776_v38 = vld [vmem:[#allocation13 + $0xcc] ss:$16 sps:$4 sm:$0xff]  }
 0x3ba   :  { %v531_v39 = vpop.xlane.xlu0 %530 }
 0x3bb   :  { %v535_v40 = vsub.f32 %v526_v26, %v531_v39  ;;  %v1771_v39 = vld [vmem:[#allocation13 + $0xc0] ss:$16 sps:$4 sm:$0xff]  }
 0x3bd   :  { %v537_v41 = vmul.f32 1.442695, %v535_v40  ;;  %v1774_v40 = vld [vmem:[#allocation13 + $0xc8] ss:$16 sps:$4 sm:$0xff]  }
 0x3bf   :  { %1849 = vpow2.f32 %v537_v41  ;;  %v1779_v41 = vld [vmem:[#allocation13 + $0xa4] ss:$16 sps:$4 sm:$0xff]  }
 0x3c2   :  { %v534_v42 = vpop.xlane.xlu1 %533 }
 0x3c3   :  { %v536_v46 = vsub.f32 %v527_v34, %v534_v42  ;;  %v1782_v42 = vld [vmem:[#allocation13 + $0xac] ss:$16 sps:$4 sm:$0xff]  }
 0x3c5   :  { %v539_v47 = vmul.f32 1.442695, %v536_v46  ;;  %v1777_v46 = vld [vmem:[#allocation13 + $0xa0] ss:$16 sps:$4 sm:$0xff]  }
 0x3c7   :  { %1851 = vpow2.f32 %v539_v47  ;;  %v1780_v47 = vld [vmem:[#allocation13 + $0xa8] ss:$16 sps:$4 sm:$0xff]  }
 0x3cc   :  { %v1850_v48 = vpop.eup %1849 }
 0x3cd   :  { %v541_v50 = vsel %vm528_vm2, %v1850_v48, 0.0 }
 0x3ce   :  { %542 = vadd.xlane.f32.xlu0 %v541_v50  ;;  %v1785_v50 = vld [vmem:[#allocation13 + $0x84] ss:$16 sps:$4 sm:$0xff]  }
 0x3d4   :  { %v1852_v51 = vpop.eup %1851 }
 0x3d5   :  { %v544_v52 = vsel %vm528_vm2, %v1852_v51, 0.0 }
 0x3d6   :  { %545 = vadd.xlane.f32.xlu1 %v544_v52  ;;  %v1788_v52 = vld [vmem:[#allocation13 + $0x8c] ss:$16 sps:$4 sm:$0xff]  }
 0x457   :  { %v543_v58 = vpop.xlane.xlu0 %542 }
 0x458   :  { %1853 = vrcp.f32 %v543_v58  ;;  %v1800_v58 = vld [vmem:[#allocation13 + $0x4c] ss:$16 sps:$4 sm:$0xff]  }
 0x45f   :  { %v546_v60 = vpop.xlane.xlu1 %545 }
 0x460   :  { %1855 = vrcp.f32 %v546_v60  ;;  %v1795_v60 = vld [vmem:[#allocation13 + $0x40] ss:$16 sps:$4 sm:$0xff]  }
 0x465   :  { %v1854_v61 = vpop.eup %1853 }
 0x466   :  { %v548_v62 = vmul.f32 %v1854_v61, %v1850_v48  ;;  %v1783_v48 = vld [vmem:[#allocation13 + $0x80] ss:$16 sps:$4 sm:$0xff]   ;;  %v1798_v61 = vld [vmem:[#allocation13 + $0x48] ss:$16 sps:$4 sm:$0xff]  }
 0x468   :  { %v551_v63 = vpack.c.bf16 %v548_v62, %v548_v62  ;;  %v1803_v62 = vld [vmem:[#allocation13 + $0x24] ss:$16 sps:$4 sm:$0xff]  }
 0x46a   :  { %1676 = vmatmul.mubr.msk.bf16.vlgmr.msra.gmra.mxu1 %vm528_vm2, %v551_v63  ;;  %v1806_v63 = vld [vmem:[#allocation13 + $0x2c] ss:$16 sps:$4 sm:$0xff]  }
 0x46b   :  { %1680 = vmatpush3.bf16.msra.mxu1 %v2218_v15  ;;  %1681 = vmatprep.mubr.msk.bf16.mxu1 %vm2071_vm0, %v2069_v4 }
 0x46c   :  { %1008 = vmatprep.subr.bf16.mxu1 %v1767_v28 }
 0x46d   :  { %v1856_v2 = vpop.eup %1855 }
 0x46e   :  { %v550_v3 = vmul.f32 %v1856_v2, %v1852_v51  ;;  %v1786_v51 = vld [vmem:[#allocation13 + $0x88] ss:$16 sps:$4 sm:$0xff]   ;;  %v1801_v2 = vld [vmem:[#allocation13 + $0x20] ss:$16 sps:$4 sm:$0xff]  }
 0x470   :  { %v552_v5 = vpack.c.bf16 %v550_v3, %v550_v3  ;;  %v1804_v3 = vld [vmem:[#allocation13 + $0x28] ss:$16 sps:$4 sm:$0xff]  }
 0x472   :  { %1682 = vmatmul.mubr.msk.bf16.vlgmr.msra.gmra.mxu1 %vm528_vm2, %v552_v5  ;;  %v1809_v5 = vld [vmem:[#allocation13 + $0x4] ss:$16 sps:$4 sm:$0xff]  }
 0x473   :  { %1040 = vmatprep.mubr.bf16.mxu1 %v2070_v27 }
 0x52a   :  { %v596_v9 = vpop.f32.mrf.mxu1 }
 0x52c   :  { %v1677_v10 = vpop.f32.mrf.mxu1 }
 0x52d   :  { %v1814_v10 = vld [vmem:[#allocation14 + $0xf8] sm:$0xff]  }
 0x52e   :  { %v599_v11 = vpop.f32.mrf.mxu1 }
 0x530   :  { %v1678_v12 = vpop.f32.mrf.mxu1 }
 0x532   :  { %v642_v13 = vpop.f32.mrf.mxu1 }
 0x533   :  { %v648_v14 = vpack.c.bf16 %v642_v13, %v596_v9  ;;  %v1813_v9 = vld [vmem:[#allocation14 + $0x78] sm:$0xff]  }
 0x534   :  { %v1683_v15 = vpop.f32.mrf.mxu1 }
 0x535   :  { %1702 = vmatmul.mubr.bf16.vlgmr.msra.gmra.mxu0 %v648_v14 }
 0x536   :  { %v645_v16 = vpop.f32.mrf.mxu1  ;;  %1083 = vmatprep.mubr.bf16.mxu0 %v2070_v27  ;;  %v1765_v27 = vld [vmem:[#allocation13 + $0xe0] ss:$16 sps:$4 sm:$0xff]   ;;  %1052 = vmatpush1.bf16.msra.mxu0 %v1768_v29  ;;  %v1815_v29 = vld [vmem:[#allocation14 + $0x38] sm:$0xff]  }
 0x537   :  { %1009 = vmatpush1.bf16.msra.mxu1 %v1765_v27  ;;  %1053 = vmatprep.subr.bf16.mxu0 %v1776_v38  ;;  %v1825_v38 = vld [vmem:[#allocation14 + $0x60] sm:$0xff]  }
 0x538   :  { %v1684_v17 = vpop.f32.mrf.mxu1  ;;  %1010 = vmatprep.subr.bf16.mxu1 %v1773_v37  ;;  %v1824_v37 = vld [vmem:[#allocation14 + $0xa8] sm:$0xff]  }
 0x53a   :  { %1054 = vmatpush1.bf16.msra.mxu0 %v1774_v40  ;;  %v1827_v40 = vld [vmem:[#allocation14 + $0x20] sm:$0xff]  }
 0x53b   :  { %1011 = vmatpush1.bf16.msra.mxu1 %v1771_v39  ;;  %1055 = vmatprep.subr.bf16.mxu0 %v1782_v42  ;;  %v1826_v39 = vld [vmem:[#allocation14 + $0xe0] sm:$0xff]   ;;  %v1829_v42 = vld [vmem:[#allocation14 + $0x58] sm:$0xff]  }
 0x53c   :  { %1012 = vmatprep.subr.bf16.mxu1 %v1779_v41  ;;  %v1828_v41 = vld [vmem:[#allocation14 + $0xa0] sm:$0xff]  }
 0x53e   :  { %1056 = vmatpush1.bf16.msra.mxu0 %v1780_v47  ;;  %v1831_v47 = vld [vmem:[#allocation14 + $0x18] sm:$0xff]  }
 0x53f   :  { %1013 = vmatpush1.bf16.msra.mxu1 %v1777_v46  ;;  %1057 = vmatprep.subr.bf16.mxu0 %v1788_v52  ;;  %v1830_v46 = vld [vmem:[#allocation14 + $0xd8] sm:$0xff]   ;;  %v1835_v52 = vld [vmem:[#allocation14 + $0x10] sm:$0xff]  }
 0x540   :  { %1014 = vmatprep.subr.bf16.mxu1 %v1785_v50  ;;  %v1833_v50 = vld [vmem:[#allocation14 + $0x50] sm:$0xff]  }
 0x542   :  { %1058 = vmatpush1.bf16.msra.mxu0 %v1786_v51  ;;  %v1834_v51 = vld [vmem:[#allocation14 + $0xd0] sm:$0xff]  }
 0x543   :  { %1015 = vmatpush1.bf16.msra.mxu1 %v1783_v48  ;;  %1059 = vmatprep.subr.bf16.mxu0 %v1794_v54  ;;  %v1832_v48 = vld [vmem:[#allocation14 + $0x98] sm:$0xff]   ;;  %v1837_v54 = vld [vmem:[#allocation14 + $0x48] sm:$0xff]  }
 0x544   :  { %1016 = vmatprep.subr.bf16.mxu1 %v1791_v53  ;;  %v1836_v53 = vld [vmem:[#allocation14 + $0x90] sm:$0xff]  }
 0x546   :  { %1060 = vmatpush1.bf16.msra.mxu0 %v1792_v56  ;;  %v1839_v56 = vld [vmem:[#allocation14 + $0x8] sm:$0xff]  }
 0x547   :  { %1017 = vmatpush1.bf16.msra.mxu1 %v1789_v55  ;;  %1061 = vmatprep.subr.bf16.mxu0 %v1800_v58  ;;  %v1838_v55 = vld [vmem:[#allocation14 + $0xc8] sm:$0xff]   ;;  %v1841_v58 = vld [vmem:[#allocation14 + $0x40] sm:$0xff]  }
 0x548   :  { %1018 = vmatprep.subr.bf16.mxu1 %v1797_v57  ;;  %v1840_v57 = vld [vmem:[#allocation14 + $0x88] sm:$0xff]  }
 0x54a   :  { %1062 = vmatpush1.bf16.msra.mxu0 %v1798_v61  ;;  %v1843_v61 = vld [vmem:[#allocation14] sm:$0xff]  }
 0x54b   :  { %1019 = vmatpush1.bf16.msra.mxu1 %v1795_v60  ;;  %1063 = vmatprep.subr.bf16.mxu0 %v1806_v63  ;;  %v1842_v60 = vld [vmem:[#allocation14 + $0xc0] sm:$0xff]   ;;  %v145_v63 = vld [vmem:[#allocation8] sm:$0xf] }
 0x54c   :  { %1020 = vmatprep.subr.bf16.mxu1 %v1803_v62  ;;  %v1844_v62 = vld [vmem:[#allocation14 + $0x80] sm:$0xff]  }
 0x54e   :  { %1064 = vmatpush1.bf16.msra.mxu0 %v1804_v3 }
 0x54f   :  { %1021 = vmatpush1.bf16.msra.mxu1 %v1801_v2  ;;  %1065 = vmatprep.subr.bf16.mxu0 %v1812_v6 }
 0x550   :  { %1022 = vmatprep.subr.bf16.mxu1 %v1809_v5  ;;  %v835_v5 = vrot.slane %v145_v63, %v2199_v49 }
 0x552   :  { %1066 = vmatpush1.bf16.msra.mxu0 %v1810_v8  ;;  %v839_v8 = vrot.slane %v145_v63, %v2212_v59 }
 0x553   :  { %1023 = vmatpush1.bf16.msra.mxu1 %v1807_v7  ;;  %1619 = vmatprep.subr.bf16.mxu0 %v1814_v10  ;;  %v831_v7 = vrot.slane %v145_v63, %v2191_v44 }
 0x554   :  { %1597 = vmatprep.subr.bf16.mxu1 %v1813_v9 }
 0x5f5   :  { %v751_v20 = vpop.f32.mrf.mxu0 }
 0x5f6   :  { %v752_v4 = vadd.f32 %v751_v20, %v668_v19  ;;  %v790_v20 = vsub.s32 3, %v2188_v43 }
 0x5f7   :  { %v1703_v21 = vpop.f32.mrf.mxu0 }
 0x5f8   :  { %v2247_v22 = vadd.f32 %v752_v4, %v2159_v0  ;;  %v843_v6 = vrot.slane %v145_v63, %v790_v20 }
 0x5f9   :  { %v754_v23 = vpop.f32.mrf.mxu0 }
 0x5fa   :  { %v755_v24 = vadd.f32 %v754_v23, %v668_v19  ;;  %760 = vadd.xlane.f32.xlu0 %v2247_v22 }
 0x5fb   :  { %v1704_v25 = vpop.f32.mrf.mxu0 }
 0x5fc   :  { %v2251_v26 = vadd.f32 %v755_v24, %v2161_v1  ;;  %v791_v24 = vrot.slane %v2193_v45, %v790_v20 }
 0x5fe   :  { %762 = vadd.xlane.f32.xlu1 %v2251_v26 }
 0x683   :  { %v761_v0 = vpop.xlane.xlu0 %760 }
 0x684   :  { %v764_v31 = vmul.f32 0.0078125, %v761_v0 }
 0x686   :  { %v2255_v32 = vsub.f32 %v2247_v22, %v764_v31  ;;  %v1817_v31 = vld [vmem:[#allocation14 + $0x70] sm:$0xff]  }
 0x687   :  { %v763_v33 = vpop.xlane.xlu1 %762 }
 0x688   :  { %v765_v34 = vmul.f32 0.0078125, %v763_v33  ;;  %v768_v1 = vmul.f32 %v2255_v32, %v2255_v32  ;;  %v1818_v33 = vld [vmem:[#allocation14 + $0xf0] sm:$0xff]  }
 0x68a   :  { %v2260_v35 = vsub.f32 %v2251_v26, %v765_v34  ;;  %770 = vadd.xlane.f32.xlu0 %v768_v1  ;;  %v1820_v34 = vld [vmem:[#allocation14 + $0xb0] sm:$0xff]   ;;  %v1821_v1 = vld [vmem:[#allocation14 + $0x68] sm:$0xff]  }
 0x68c   :  { %v769_v36 = vmul.f32 %v2260_v35, %v2260_v35 }
 0x68e   :  { %772 = vadd.xlane.f32.xlu1 %v769_v36  ;;  %v1823_v36 = vld [vmem:[#allocation14 + $0x28] sm:$0xff]  }
 0x713   :  { %v771_v11 = vpop.xlane.xlu0 %770 }
 0x714   :  { %v774_v12 = vmul.f32 0.0078125, %v771_v11 }
 0x716   :  { %v776_v13 = vadd.f32 1e-05, %v774_v12 }
 0x717   :  { %v773_v14 = vpop.xlane.xlu1 %772 }
 0x718   :  { %1857 = vrsqrt.f32 %v776_v13  ;;  %v775_v15 = vmul.f32 0.0078125, %v773_v14 }
 0x71a   :  { %v777_v16 = vadd.f32 1e-05, %v775_v15 }
 0x71c   :  { %1859 = vrsqrt.f32 %v777_v16 }
 0x725   :  { %v1858_v17 = vpop.eup %1857 }
 0x726   :  { %v780_v19 = vmul.f32 %v1858_v17, %v2255_v32  ;;  %v1819_v32 = vld [vmem:[#allocation14 + $0x30] sm:$0xff]  }
 0x728   :  { %v786_v23 = vmul.f32 %v785_v18, %v780_v19 }
 0x729   :  { %v1860_v4 = vpop.eup %1859 }
 0x72a   :  { %v781_v21 = vmul.f32 %v1860_v4, %v2260_v35  ;;  %v792_v27 = vadd.f32 %v791_v24, %v786_v23  ;;  %v1822_v35 = vld [vmem:[#allocation14 + $0xe8] sm:$0xff]  }
 0x72c   :  { %v787_v25 = vmul.f32 %v785_v18, %v781_v21 }
 0x72e   :  { %v793_v28 = vadd.f32 %v791_v24, %v787_v25 }
 0x730   :  { %v794_v0 = vpack.c.bf16 %v793_v28, %v792_v27 }
 0x732   :  { %1041 = vmatmul.mubr.bf16.vlgmr.msra.gmra.mxu1 %v794_v0  ;;  %1084 = vmatmul.mubr.bf16.vlgmr.msra.gmra.mxu0 %v794_v0 }
 0x733   :  { %1598 = vmatpush3.bf16.msra.mxu1 %v1815_v29  ;;  %1620 = vmatpush3.bf16.msra.mxu0 %v1816_v30 }
 0x734   :  { %1599 = vmatprep.subr.bf16.mxu1 %v1817_v31  ;;  %1621 = vmatprep.subr.bf16.mxu0 %v1818_v33  ;;  %v1172_v33 = vsub.s32 5, %v2188_v43 }
 0x737   :  { %1600 = vmatpush3.bf16.msra.mxu1 %v1819_v32  ;;  %1622 = vmatpush3.bf16.msra.mxu0 %v1820_v34 }
 0x738   :  { %1601 = vmatprep.subr.bf16.mxu1 %v1821_v1  ;;  %1623 = vmatprep.subr.bf16.mxu0 %v1822_v35  ;;  %v1173_v1 = vrot.slane %v2193_v45, %v1172_v33 }
 0x73b   :  { %1602 = vmatpush3.bf16.msra.mxu1 %v1823_v36  ;;  %1624 = vmatpush3.bf16.msra.mxu0 %v1824_v37 }
 0x73c   :  { %1603 = vmatprep.subr.bf16.mxu1 %v1825_v38  ;;  %1625 = vmatprep.subr.bf16.mxu0 %v1826_v39 }
 0x73f   :  { %1604 = vmatpush3.bf16.msra.mxu1 %v1827_v40  ;;  %1626 = vmatpush3.bf16.msra.mxu0 %v1828_v41 }
 0x740   :  { %1605 = vmatprep.subr.bf16.mxu1 %v1829_v42  ;;  %1627 = vmatprep.subr.bf16.mxu0 %v1830_v46 }
 0x743   :  { %1606 = vmatpush3.bf16.msra.mxu1 %v1831_v47  ;;  %1628 = vmatpush3.bf16.msra.mxu0 %v1832_v48 }
 0x744   :  { %1607 = vmatprep.subr.bf16.mxu1 %v1833_v50  ;;  %1629 = vmatprep.subr.bf16.mxu0 %v1834_v51 }
 0x747   :  { %1608 = vmatpush3.bf16.msra.mxu1 %v1835_v52  ;;  %1630 = vmatpush3.bf16.msra.mxu0 %v1836_v53 }
 0x748   :  { %1609 = vmatprep.subr.bf16.mxu1 %v1837_v54  ;;  %1631 = vmatprep.subr.bf16.mxu0 %v1838_v55 }
 0x74b   :  { %1610 = vmatpush3.bf16.msra.mxu1 %v1839_v56  ;;  %1632 = vmatpush3.bf16.msra.mxu0 %v1840_v57 }
 0x74c   :  { %1611 = vmatprep.subr.bf16.mxu1 %v1841_v58  ;;  %1633 = vmatprep.subr.bf16.mxu0 %v1842_v60 }
 0x74f   :  { %1612 = vmatpush3.bf16.msra.mxu1 %v1843_v61  ;;  %1634 = vmatpush3.bf16.msra.mxu0 %v1844_v62 }
 0x7f2   :  { %v1042_v2 = vpop.f32.mrf.mxu1  ;;  %v1085_v3 = vpop.f32.mrf.mxu0 }
 0x7f3   :  { %v1043_v17 = vadd.f32 %v1042_v2, %v831_v7  ;;  %v1086_v18 = vadd.f32 %v1085_v3, %v839_v8 }
 0x7f4   :  { %v1044_v9 = vpop.f32.mrf.mxu1  ;;  %v1087_v10 = vpop.f32.mrf.mxu0 }
 0x7f5   :  { %v1045_v13 = vadd.f32 %v1044_v9, %v835_v5  ;;  %v1088_v14 = vadd.f32 %v1087_v10, %v843_v6  ;;  %v1094_v27 = vmax.f32 %v1043_v17, 0.0  ;;  %v1096_v28 = vmax.f32 %v1086_v18, 0.0 }
 0x7f6   :  { %v1046_v11 = vpop.f32.mrf.mxu1  ;;  %v1089_v12 = vpop.f32.mrf.mxu0 }
 0x7f7   :  { %v1047_v15 = vadd.f32 %v1046_v11, %v831_v7  ;;  %v1090_v16 = vadd.f32 %v1089_v12, %v839_v8  ;;  %v1095_v24 = vmax.f32 %v1045_v13, 0.0  ;;  %v1097_v44 = vmax.f32 %v1088_v14, 0.0 }
 0x7f8   :  { %v1048_v19 = vpop.f32.mrf.mxu1  ;;  %v1091_v4 = vpop.f32.mrf.mxu0 }
 0x7f9   :  { %v1049_v49 = vadd.f32 %v1048_v19, %v835_v5  ;;  %v1092_v21 = vadd.f32 %v1091_v4, %v843_v6  ;;  %v1098_v23 = vmax.f32 %v1047_v15, 0.0  ;;  %v1100_v20 = vmax.f32 %v1090_v16, 0.0 }
 0x7fb   :  { %v1099_v25 = vmax.f32 %v1049_v49, 0.0  ;;  %v1101_v59 = vmax.f32 %v1092_v21, 0.0  ;;  %v1102_v0 = vpack.c.bf16 %v1098_v23, %v1094_v27  ;;  %v1104_v31 = vpack.c.bf16 %v1100_v20, %v1096_v28 }
 0x7fd   :  { %v1103_v29 = vpack.c.bf16 %v1099_v25, %v1095_v24  ;;  %v1105_v30 = vpack.c.bf16 %v1101_v59, %v1097_v44 }
 0x7ff   :  { %1398 = vmatprep.mubr.bf16.mxu1 %v1103_v29  ;;  %1439 = vmatprep.mubr.bf16.mxu0 %v1105_v30 }
 0x800   :  { %1399 = vmatmul.mubr.bf16.vlgmr.msra.gmra.mxu1 %v1102_v0  ;;  %1440 = vmatmul.mubr.bf16.vlgmr.msra.gmra.mxu0 %v1104_v31 }
 0x8c0   :  { %v1613_v32 = vpop.f32.mrf.mxu1  ;;  %v1635_v34 = vpop.f32.mrf.mxu0 }
 0x8c2   :  { %v1614_v35 = vpop.f32.mrf.mxu1  ;;  %v1636_v36 = vpop.f32.mrf.mxu0 }
 0x8c3   :  { %v1615_v37 = vadd.f32 %v1614_v35, %v1613_v32  ;;  %v1637_v41 = vadd.f32 %v1636_v36, %v1635_v34 }
 0x8c4   :  { %v1616_v38 = vpop.f32.mrf.mxu1  ;;  %v1638_v39 = vpop.f32.mrf.mxu0 }
 0x8c5   :  { %v1401_v40 = vadd.f32 %v1615_v37, %v1173_v1 }
 0x8c6   :  { %v1617_v42 = vpop.f32.mrf.mxu1  ;;  %v1639_v46 = vpop.f32.mrf.mxu0 }
 0x8c7   :  { %v1442_v47 = vadd.f32 %v1637_v41, %v1401_v40  ;;  %v1618_v48 = vadd.f32 %v1617_v42, %v1616_v38  ;;  %v1640_v52 = vadd.f32 %v1639_v46, %v1638_v39 }
 0x8c9   :  { %v1448_v50 = vadd.f32 %v1442_v47, %v2247_v22  ;;  %v1404_v51 = vadd.f32 %v1618_v48, %v1173_v1 }
 0x8cb   :  { %1450 = vst [vmem:[#allocation16] sm:$0xff] %v1448_v50  ;;  %v1445_v43 = vadd.f32 %v1640_v52, %v1404_v51 }
 0x8cd   :  { %v1449_v45 = vadd.f32 %v1445_v43, %v2251_v26 }
 0x8cf   :  { %1451 = vst [vmem:[#allocation16 + $0x8] sm:$0xff] %v1449_v45 }
 0x8d0   :  { %2032 = shalt.err (!%p2029_p2)
}
 0x8d1   :  { %1463 = dma.vmem_to_hbm [thread:$0]  %s1458_s1, 256, %s2296_s9, [#allocation4], %s2055_s14, %s2055_s14, %s2056_s15  }
 0x8d2   :  { %2051 = dma.done.wait [#allocation4], 256  }
 0x8d3   :  { %2052 = vsyncadd [#allocation4], 4294967040 }
 0x8d4   :  { %1467 = vsyncpa [#allocation3], 1 }
 0x8d5   :  { %1468 = vsyncpa [#allocation6], 1 }
 0x8d6   :  { %1469 = vsyncpa [#allocation9], 1 }
 0x8d7   :  { %1470 = vsyncpa [#allocation12], 1 }
 0x8d8   :  { %1471 = vsyncpa [#allocation15], 1 }
 0x8d9   :  { %1472 = vsyncpa [#allocation4], 1 }

</bundles_post_ra>
